<compile_context>
chip_gen: v5e
topology: v5e:2x2
jax: 0.10.0
libtpu: 0.0.40
codegen_flags: <defaults>
</compile_context>

<pallas_src>
import jax
import jax.numpy as jnp
from jax.experimental import pallas as pl
from jax.experimental.pallas import tpu as pltpu


def _round_up(x, mult):
    return ((x + mult - 1) // mult) * mult


def _sublane_multiple(dtype):
    # Packed-sublane granularity: 8 rows for 4-byte, 16 for 2-byte, 32 for 1-byte.
    return max(8, 32 // jnp.dtype(dtype).itemsize)


def _vmem_capacity_bytes():
    try:
        cap = getattr(pltpu.get_tpu_info(), "vmem_capacity_bytes", None)
        if cap:
            return int(cap)
    except Exception:
        pass
    return 64 << 20  # conservative fallback: v7x has 64 MiB VMEM per TensorCore


def _circle_lse_kernel(logits_ref, side_ref, out_ref):
    """Per-row logsumexp of the circle-reweighted logits.

    side_ref columns (precomputed in the wrapper; m and gamma already folded):
      0: sign_g = +gamma (row not in labels) / -gamma (row in labels)
      1: bias_g = gamma*m            /  gamma*(1+m)
      2: delta  = m                  /  1-m
    """
    x = logits_ref[...].astype(jnp.float32)          # upcast after (possibly bf16) load
    side = side_ref[...]                             # (TILE_N, 3) f32, single tiny load
    sign_g = side[:, 0:1]
    bias_g = side[:, 1:2]
    delta = side[:, 2:3]

    # alpha * gamma fused into one clamp (gamma > 0 commutes with clamp_min).
    scaled = jnp.maximum(sign_g * x + bias_g, 0.0) * (x - delta)     # (TILE_N, C) f32

    # Numerically stable per-row logsumexp.
    row_max = jnp.max(scaled, axis=1, keepdims=True)                 # (TILE_N, 1)
    out_ref[...] = row_max + jnp.log(
        jnp.sum(jnp.exp(scaled - row_max), axis=1, keepdims=True))


def circle_loss(logits, labels, m=0.25, gamma=256.0):
    """Pallas TPU implementation of CircleLoss.forward. Returns a scalar f32."""
    N, C = logits.shape
    labels = labels.astype(jnp.int32)
    m = float(m)
    gamma = float(gamma)
    assert gamma > 0.0, "gamma must be positive (needed to fold gamma into the clamp)"

    # Row r is "selected" iff r appears anywhere in labels (PyTorch's
    # alpha[labels] / delta[labels] row indexing). O(N), wrapper-side.
    sel = jnp.zeros((N,), jnp.bool_).at[labels].set(True)
    sign_g = jnp.where(sel, -gamma, gamma).astype(jnp.float32)
    bias_g = jnp.where(sel, (1.0 + m) * gamma, m * gamma).astype(jnp.float32)
    delta = jnp.where(sel, 1.0 - m, m).astype(jnp.float32)
    side = jnp.stack([sign_g, bias_g, delta], axis=1)        # (N, 3): one small DMA/step

    # Target term of the cross entropy, scaled[i, labels[i]], computed analytically
    # from an O(N) gather — no in-kernel iota / one-hot / masked reduction.
    tgt_logit = logits[jnp.arange(N), labels].astype(jnp.float32)
    tgt_scaled = jnp.maximum(sign_g * tgt_logit + bias_g, 0.0) * (tgt_logit - delta)

    # ---------------- generation-aware tiling ----------------
    itemsize = jnp.dtype(logits.dtype).itemsize
    vmem_cap = _vmem_capacity_bytes()
    # Scoped limit ~3/4 of physical: 96 MiB on 128 MiB parts (v5e/v6e), 48 MiB on v7x.
    vmem_limit = min(96 << 20, (vmem_cap * 3) // 4)

    # Per-row VMEM cost: double-buffered native-dtype logits block + ~6 live f32
    # (TILE_N, C) intermediates in the kernel body + tiny side/output blocks.
    per_row_bytes = 2 * C * itemsize + 6 * C * 4 + 64
    usable = int(vmem_limit * 0.7)

    sub = _sublane_multiple(logits.dtype)
    tile_from_vmem = max(sub, (usable // per_row_bytes) // sub * sub)
    # Keep >= ~8 row blocks when N allows (megacore sharding + pipeline depth).
    tile_for_grid = max(sub, _round_up(pl.cdiv(N, 8), sub))
    tile_n = min(tile_from_vmem, tile_for_grid)

    # If even the minimal tile does not fit the default budget, widen the scoped
    # limit (bounded by physical VMEM) rather than failing at compile time.
    # TODO(synk): replace this with a C-chunked online logsumexp for huge C.
    if sub * per_row_bytes > usable:
        need = int(sub * per_row_bytes / 0.7) + (4 << 20)
        vmem_limit = max(vmem_limit, min((vmem_cap * 7) // 8, need))

    n_pad = _round_up(N, tile_n)
    if n_pad != N:
        pad = n_pad - N
        logits_p = jnp.pad(logits, ((0, pad), (0, 0)))
        side_p = jnp.pad(side, ((0, pad), (0, 0)))   # padded rows -> scaled==0, finite lse
    else:
        logits_p, side_p = logits, side
    grid_n = n_pad // tile_n

    # Per-row LSE output, (n_pad, 1) f32. The store is tiny relative to the logits
    # DMA; the target term is subtracted wrapper-side.
    lse = pl.pallas_call(
        _circle_lse_kernel,
        out_shape=jax.ShapeDtypeStruct((n_pad, 1), jnp.float32),
        grid=(grid_n,),
        in_specs=[
            pl.BlockSpec((tile_n, C), lambda i: (i, 0)),   # logits, native dtype
            pl.BlockSpec((tile_n, 3), lambda i: (i, 0)),   # packed per-row constants
        ],
        out_specs=pl.BlockSpec((tile_n, 1), lambda i: (i, 0)),
        compiler_params=pltpu.CompilerParams(
            dimension_semantics=("parallel",),   # v7x: row blocks split across both TCs
            vmem_limit_bytes=int(vmem_limit),
        ),
    )(logits_p, side_p)

    # Mean NLL over the real rows: NLL_i = lse_i - scaled[i, labels[i]].
    return (jnp.sum(lse[:N, 0]) - jnp.sum(tgt_scaled)) / N


def circle_loss_ref(logits, labels, m=0.25, gamma=256.0):
    """Pure-JAX reference mirroring the PyTorch module semantics."""
    N, C = logits.shape
    sel = jnp.any(jnp.arange(N)[:, None] == labels[None, :], axis=1)[:, None]  # (N, 1)
    alpha = jnp.where(sel,
                      jnp.maximum(-logits + 1.0 + m, 0.0),
                      jnp.maximum(logits + m, 0.0))
    delta = jnp.where(sel, 1.0 - m, m)
    scaled = alpha * (logits - delta) * gamma
    logp = jax.nn.log_softmax(scaled, axis=-1)
    nll = -logp[jnp.arange(N), labels]
    return jnp.mean(nll)


if __name__ == "__main__":
    key = jax.random.PRNGKey(0)
    k1, k2, k3, k4, k5, k6 = jax.random.split(key, 6)

    # Test 1: batch=8, classes=32, f32. Labels must be valid class indices AND
    # valid row indices (< N), as PyTorch's advanced indexing requires.
    N, C = 8, 32
    logits = jax.random.normal(k1, (N, C), dtype=jnp.float32)
    labels = jax.random.randint(k2, (N,), 0, N, dtype=jnp.int32)
    loss = jax.block_until_ready(circle_loss(logits, labels, m=0.25, gamma=256.0))
    ref = circle_loss_ref(logits, labels, m=0.25, gamma=256.0)
    assert jnp.allclose(loss, ref, rtol=1e-5, atol=1e-5), (loss, ref)

    # Test 2: bf16 input, N not a multiple of the bf16 sublane multiple (16),
    # exercises row padding + multi-block grid.
    N2, C2 = 20, 160
    logits2 = jax.random.normal(k3, (N2, C2), dtype=jnp.float32).astype(jnp.bfloat16)
    labels2 = jax.random.randint(k4, (N2,), 0, N2, dtype=jnp.int32)
    loss2 = jax.block_until_ready(circle_loss(logits2, labels2, m=0.25, gamma=256.0))
    ref2 = circle_loss_ref(logits2.astype(jnp.float32), labels2, m=0.25, gamma=256.0)
    assert jnp.allclose(loss2, ref2, rtol=2e-2, atol=2e-2), (loss2, ref2)

    # Test 3: larger batch -> grid of ~8 pipelined "parallel" row blocks.
    N3, C3 = 64, 40
    logits3 = jax.random.normal(k5, (N3, C3), dtype=jnp.float32)
    labels3 = jax.random.randint(k6, (N3,), 0, C3, dtype=jnp.int32)  # < min(N3, C3)
    loss3 = jax.block_until_ready(circle_loss(logits3, labels3, m=0.25, gamma=256.0))
    ref3 = circle_loss_ref(logits3, labels3, m=0.25, gamma=256.0)
    assert jnp.allclose(loss3, ref3, rtol=1e-5, atol=1e-5), (loss3, ref3)

    print("KERNEL_OK")
</pallas_src>

<mosaic_0001>
module attributes {stable_mosaic.version = 11 : i64} {
  func.func @_circle_lse_kernel(%arg0: i32, %arg1: memref<8x32xf32, #tpu.memory_space<vmem>>, %arg2: memref<8x3xf32, #tpu.memory_space<vmem>>, %arg3: memref<8x1xf32, #tpu.memory_space<vmem>>) attributes {dimension_semantics = [#tpu.dimension_semantics<parallel>], iteration_bounds = array<i64: 1>, scalar_prefetch = 0 : i64, scratch_operands = 0 : i64, tpu.core_type = #tpu.core_type<tc>, window_params = [{transform_indices = @transform_0, window_bounds = array<i64: 8, 32>}, {transform_indices = @transform_1, window_bounds = array<i64: 8, 3>}, {transform_indices = @transform_2, window_bounds = array<i64: 8, 1>}]} {
    %c0 = arith.constant 0 : index
    %c0_0 = arith.constant 0 : index
    %0 = vector.load %arg1[%c0, %c0_0] : memref<8x32xf32, #tpu.memory_space<vmem>>, vector<8x32xf32>
    %c0_1 = arith.constant 0 : index
    %c0_2 = arith.constant 0 : index
    %1 = vector.load %arg2[%c0_1, %c0_2] : memref<8x3xf32, #tpu.memory_space<vmem>>, vector<8x3xf32>
    %2 = vector.extract_strided_slice %1 {offsets = [0, 0], sizes = [8, 1], strides = [1, 1]} : vector<8x3xf32> to vector<8x1xf32>
    %3 = vector.extract_strided_slice %1 {offsets = [0, 1], sizes = [8, 1], strides = [1, 1]} : vector<8x3xf32> to vector<8x1xf32>
    %4 = vector.extract_strided_slice %1 {offsets = [0, 2], sizes = [8, 1], strides = [1, 1]} : vector<8x3xf32> to vector<8x1xf32>
    %5 = vector.broadcast %2 : vector<8x1xf32> to vector<8x32xf32>
    %6 = arith.mulf %5, %0 : vector<8x32xf32>
    %7 = vector.broadcast %3 : vector<8x1xf32> to vector<8x32xf32>
    %8 = arith.addf %6, %7 : vector<8x32xf32>
    %cst = arith.constant 0.000000e+00 : f32
    %9 = vector.broadcast %cst : f32 to vector<8x32xf32>
    %10 = arith.maximumf %8, %9 : vector<8x32xf32>
    %11 = vector.broadcast %4 : vector<8x1xf32> to vector<8x32xf32>
    %12 = arith.subf %0, %11 : vector<8x32xf32>
    %13 = arith.mulf %10, %12 : vector<8x32xf32>
    %cst_3 = arith.constant dense<0xFF800000> : vector<8xf32>
    %14 = vector.multi_reduction <maximumf>, %13, %cst_3 [1] : vector<8x32xf32> to vector<8xf32>
    %15 = vector.shape_cast %14 : vector<8xf32> to vector<8x1xf32>
    %16 = vector.broadcast %15 : vector<8x1xf32> to vector<8x32xf32>
    %17 = arith.subf %13, %16 : vector<8x32xf32>
    %18 = math.exp %17 : vector<8x32xf32>
    %cst_4 = arith.constant dense<0.000000e+00> : vector<8xf32>
    %19 = vector.multi_reduction <add>, %18, %cst_4 [1] : vector<8x32xf32> to vector<8xf32>
    %20 = vector.shape_cast %19 : vector<8xf32> to vector<8x1xf32>
    %21 = math.log %20 : vector<8x1xf32>
    %22 = arith.addf %15, %21 : vector<8x1xf32>
    %c0_5 = arith.constant 0 : index
    %c0_6 = arith.constant 0 : index
    %23 = vector.load %arg3[%c0_5, %c0_6] : memref<8x1xf32, #tpu.memory_space<vmem>>, vector<8x1xf32>
    tpu.vector_store %arg3[%c0_5, %c0_6], %22 {strides = array<i32>} : memref<8x1xf32, #tpu.memory_space<vmem>>, vector<8x1xf32>,
    return
  }
  func.func @transform_0(%arg0: i32) -> (i32, i32) {
    %c0_i32 = arith.constant 0 : i32
    %c0_i32_0 = arith.constant 0 : i32
    return %arg0, %c0_i32 : i32, i32
  }
  func.func @transform_1(%arg0: i32) -> (i32, i32) {
    %c0_i32 = arith.constant 0 : i32
    %c0_i32_0 = arith.constant 0 : i32
    return %arg0, %c0_i32 : i32, i32
  }
  func.func @transform_2(%arg0: i32) -> (i32, i32) {
    %c0_i32 = arith.constant 0 : i32
    %c0_i32_0 = arith.constant 0 : i32
    return %arg0, %c0_i32 : i32, i32
  }
}

</mosaic_0001>

<bundles_post_ra>
// kernel: tpu_custom_call.1
= control target key start
LH: loop header
LB: loop body
LE: loop exit
PB: predicated region body
PF: predicated region fallthrough
CT: control target
= control target key end

     0   :  { %v61_v0 = vmov 0   ;;  %v62_v2 = vmov 2   ;;  %v63_v3 = vmov 1   ;;  %vm31_vm0 = vcmask 261120   ;;  %s88_s1 = inlined_call_operand.vmem [shape: f32[8,3], index: 1, kind: input, shape index: {}]   ;;  %s89_s0 = inlined_call_operand.vmem [shape: f32[8,32], index: 0, kind: input, shape index: {}]   ;;  %s90_s2 = inlined_call_operand.vmem [shape: f32[8,1], index: 2, kind: output, shape index: {}]  }
   0x1   :  { %53 = vset.pattern.permute.xlu0 %v61_v0  ;;  %v12_v1 = vld [vmem:[%s88_s1] sm:$0xff]  ;;  %55 = vset.pattern.permute.xlu1 %v62_v2  ;;  %vm44_vm1 = vcmask 7168  }
   0x2   :  { %15 = vperm.xlu0 %53, %v12_v1   ;;  %26 = vperm.xlu1 %55, %v12_v1   ;;  %v11_v5 = vld [vmem:[%s89_s0] sm:$0xff] }
   0xa   :  { %54 = vset.pattern.permute.xlu0 %v63_v3 }
   0xb   :  { %20 = vperm.xlu0 %54, %v12_v1  }
  0x13   :  { %56 = vset.pattern.permute.xlu0 %v62_v2 }
  0x74   :  { %v16_v4 = vpop.permute.xlu0 %15  ;;  %v27_v6 = vpop.permute.xlu1 %26 }
  0x75   :  { %v18_v7 = vmul.f32 %v16_v4, %v11_v5  ;;  %v29_v10 = vsub.f32 %v11_v5, %v27_v6 }
  0x7d   :  { %v21_v8 = vpop.permute.xlu0 %20 }
  0x7e   :  { %v23_v9 = vadd.f32 %v21_v8, %v18_v7 }
  0x80   :  { %v24_v11 = vmax.f32 %v23_v9, 0.0 }
  0x82   :  { %v30_v12 = vmul.f32 %v29_v10, %v24_v11 }
  0x84   :  { %v32_v13 = vsel %vm31_vm0, %v30_v12, -inf }
  0x85   :  { %33 = vmax.xlane.f32.xlu1 %v32_v13 }
  0xf8   :  { %v34_v14 = vpop.xlane.xlu1 %33 }
  0xf9   :  { %v35_v15 = vsub.f32 %v30_v12, %v34_v14 }
  0xfb   :  { %v36_v16 = vmul.f32 1.442695, %v35_v15 }
  0xfd   :  { %57 = vpow2.f32 %v36_v16 }
 0x103   :  { %v58_v17 = vpop.eup %57 }
 0x104   :  { %v38_v18 = vsel %vm31_vm0, %v58_v17, 0.0 }
 0x105   :  { %39 = vadd.xlane.f32.xlu2 %v38_v18 }
 0x178   :  { %v40_v19 = vpop.xlane.xlu2 %39 }
 0x179   :  { %59 = vlog2.f32 %v40_v19 }
 0x17f   :  { %v60_v20 = vpop.eup %59 }
 0x180   :  { %v42_v21 = vmul.f32 0.6931472, %v60_v20 }
 0x182   :  { %v43_v22 = vadd.f32 %v42_v21, %v34_v14 }
 0x184   :  { %45 = vst.msk [vmem:[%s90_s2] sm:$0xff] %vm44_vm1, %v43_v22 }

</bundles_post_ra>
